<compile_context>
chip_gen: v7x
topology: tpu7x:2x2x1
jax: 0.10.0
libtpu: 0.0.40
codegen_flags: <defaults>
</compile_context>

<pallas_src>
import jax
import jax.numpy as jnp
from jax.experimental import pallas as pl
from jax.experimental.pallas import tpu as pltpu


def _qnet_duel_kernel(x_ref, w_s1_ref, w_s2_ref, w_va1_ref, w_q_ref, b_ref,
                      out_ref):
    f32 = jnp.float32
    mid = w_s1_ref.shape[1]
    head1_w = w_va1_ref.shape[1]      # 2 * mid
    out_pad = out_ref.shape[1]        # lane-padded output width (mult of 128)

    x = x_ref[...].astype(f32)
    b = b_ref[...].astype(f32)        # packed bias slab [4, bpad]
    b_s1 = b[0:1, :mid]
    b_s2 = b[1:2, :mid]
    b_va1 = b[2:3, :head1_w]
    b_q = b[3:4, :out_pad]

    # ---- shared trunk: net_state (Linear, ReLU, Linear, ReLU) ----
    h = jnp.dot(x, w_s1_ref[...].astype(f32), preferred_element_type=f32) + b_s1
    h = jnp.maximum(h, 0.0)
    t = jnp.dot(h, w_s2_ref[...].astype(f32), preferred_element_type=f32) + b_s2
    t = jnp.maximum(t, 0.0)

    # ---- fused head layer 1: columns = [value-hidden | advantage-hidden] ----
    va = jnp.dot(t, w_va1_ref[...].astype(f32), preferred_element_type=f32) + b_va1
    va = jnp.maximum(va, 0.0)                                   # [TB, 2*mid]

    # ---- fused head layer 2 with the dueling combine folded into W_q ----
    # columns 0..A-1 are the final Q values; columns A.. are exact zeros.
    q = jnp.dot(va, w_q_ref[...].astype(f32), preferred_element_type=f32) + b_q
    out_ref[...] = q.astype(out_ref.dtype)


def qnet_duel_forward(state, packed, action_dim, *, block_batch=1024):
    """state: [B, state_dim] f32. packed: output of pack_params()."""
    batch, state_dim = state.shape
    w_s1, w_s2 = packed["w_s1"], packed["w_s2"]
    w_va1, w_q = packed["w_va1"], packed["w_q"]
    biases = packed["biases"]
    out_pad = w_q.shape[1]

    tb = min(block_batch, batch)          # batch tile (full batch if small)
    grid = (pl.cdiv(batch, tb),)

    def resident(a):
        # Full-array block, same block index every step -> DMA'd once.
        return pl.BlockSpec(a.shape, lambda i: (0, 0))

    out_padded = pl.pallas_call(
        _qnet_duel_kernel,
        out_shape=jax.ShapeDtypeStruct((batch, out_pad), jnp.float32),
        grid=grid,
        in_specs=[
            pl.BlockSpec((tb, state_dim), lambda i: (i, 0)),    # x tile
            resident(w_s1), resident(w_s2),
            resident(w_va1), resident(w_q),
            resident(biases),
        ],
        out_specs=pl.BlockSpec((tb, out_pad), lambda i: (i, 0)),
        compiler_params=pltpu.CompilerParams(
            dimension_semantics=("parallel",)),
    )(state, w_s1, w_s2, w_va1, w_q, biases)

    return out_padded[:, :action_dim]


def init_params(key, mid_dim, state_dim, action_dim):
    """Per-layer params like the torch module; weights stored as [in, out]."""
    def linear(key, fan_in, fan_out):
        kw, kb = jax.random.split(key)
        bound = 1.0 / jnp.sqrt(fan_in)
        w = jax.random.uniform(kw, (fan_in, fan_out), jnp.float32, -bound, bound)
        b = jax.random.uniform(kb, (1, fan_out), jnp.float32, -bound, bound)
        return w, b

    keys = jax.random.split(key, 6)
    p = {}
    p["w_s1"], p["b_s1"] = linear(keys[0], state_dim, mid_dim)
    p["w_s2"], p["b_s2"] = linear(keys[1], mid_dim, mid_dim)
    p["w_v1"], p["b_v1"] = linear(keys[2], mid_dim, mid_dim)
    p["w_v2"], p["b_v2"] = linear(keys[3], mid_dim, 1)
    p["w_a1"], p["b_a1"] = linear(keys[4], mid_dim, mid_dim)
    p["w_a2"], p["b_a2"] = linear(keys[5], mid_dim, action_dim)
    return p


def pack_params(p, action_dim, dtype=jnp.float32):
    """Fuse the value/advantage heads and fold the dueling combine into W_q.

    Kernel param layout:
      w_s1  [state, mid]        w_s2 [mid, mid]
      w_va1 [mid, 2*mid]     = [w_v1 | w_a1]
      w_q   [2*mid, OUT_PAD]    top block  = w_v2 broadcast to A columns
                                bottom blk = w_a2 - mean over action columns
                                (columns beyond A are zero; lane-padded)
      biases [4, bpad]          rows = (b_s1, b_s2, b_va1, b_q), lane-padded
    With this packing,  q = relu(...) @ w_q + b_q  equals
      q_val + q_adv - mean(q_adv)   exactly (all folded ops are linear).
    """
    mid = p["w_s2"].shape[0]
    out_pad = ((action_dim + 127) // 128) * 128

    w_va1 = jnp.concatenate([p["w_v1"], p["w_a1"]], axis=1)          # [mid, 2*mid]
    b_va1 = jnp.concatenate([p["b_v1"], p["b_a1"]], axis=1)          # [1, 2*mid]

    w_a2_c = p["w_a2"] - p["w_a2"].mean(axis=1, keepdims=True)       # centered
    b_a2_c = p["b_a2"] - p["b_a2"].mean(axis=1, keepdims=True)

    w_q = jnp.zeros((2 * mid, out_pad), jnp.float32)
    w_q = w_q.at[:mid, :action_dim].set(
        jnp.broadcast_to(p["w_v2"], (mid, action_dim)))
    w_q = w_q.at[mid:, :action_dim].set(w_a2_c)
    b_q = jnp.zeros((1, out_pad), jnp.float32)
    b_q = b_q.at[:, :action_dim].set(p["b_v2"] + b_a2_c)

    bpad = max(out_pad, 2 * mid)

    def pad_row(b):
        return jnp.pad(b, ((0, 0), (0, bpad - b.shape[1])))

    biases = jnp.concatenate(
        [pad_row(p["b_s1"]), pad_row(p["b_s2"]), pad_row(b_va1), pad_row(b_q)],
        axis=0)                                                      # [4, bpad]

    return {
        "w_s1": p["w_s1"].astype(dtype),
        "w_s2": p["w_s2"].astype(dtype),
        "w_va1": w_va1.astype(dtype),
        "w_q": w_q.astype(dtype),
        "biases": biases.astype(dtype),
    }


def reference_forward(state, p):
    """Pure-JAX reference on the unfused params (matches the torch module)."""
    h = jnp.maximum(state @ p["w_s1"] + p["b_s1"], 0.0)
    t = jnp.maximum(h @ p["w_s2"] + p["b_s2"], 0.0)
    v = jnp.maximum(t @ p["w_v1"] + p["b_v1"], 0.0)
    q_val = v @ p["w_v2"] + p["b_v2"]
    a = jnp.maximum(t @ p["w_a1"] + p["b_a1"], 0.0)
    q_adv = a @ p["w_a2"] + p["b_a2"]
    return q_val + q_adv - q_adv.mean(axis=1, keepdims=True)


if __name__ == "__main__":
    mid_dim, state_dim, action_dim = 32, 16, 4
    batch = 2

    key = jax.random.PRNGKey(0)
    k_params, k_state = jax.random.split(key)
    params = init_params(k_params, mid_dim, state_dim, action_dim)
    packed = pack_params(params, action_dim)
    state = jax.random.normal(k_state, (batch, state_dim), jnp.float32)

    q = qnet_duel_forward(state, packed, action_dim)
    jax.block_until_ready(q)

    q_ref = reference_forward(state, params)
    assert q.shape == (batch, action_dim)
    assert jnp.allclose(q, q_ref, atol=1e-4, rtol=1e-4), float(
        jnp.max(jnp.abs(q - q_ref)))

    print("KERNEL_OK")
</pallas_src>

<mosaic_0001>
module attributes {stable_mosaic.version = 11 : i64} {
  func.func @_qnet_duel_kernel(%arg0: i32, %arg1: memref<2x16xf32, #tpu.memory_space<vmem>>, %arg2: memref<16x32xf32, #tpu.memory_space<vmem>>, %arg3: memref<32x32xf32, #tpu.memory_space<vmem>>, %arg4: memref<32x64xf32, #tpu.memory_space<vmem>>, %arg5: memref<64x128xf32, #tpu.memory_space<vmem>>, %arg6: memref<4x128xf32, #tpu.memory_space<vmem>>, %arg7: memref<2x128xf32, #tpu.memory_space<vmem>>) attributes {dimension_semantics = [#tpu.dimension_semantics<parallel>], iteration_bounds = array<i64: 1>, scalar_prefetch = 0 : i64, scratch_operands = 0 : i64, tpu.core_type = #tpu.core_type<tc>, window_params = [{transform_indices = @transform_0, window_bounds = array<i64: 2, 16>}, {pipeline_mode = #tpu.pipeline_mode<synchronous>, transform_indices = @transform_1, window_bounds = array<i64: 16, 32>}, {pipeline_mode = #tpu.pipeline_mode<synchronous>, transform_indices = @transform_2, window_bounds = array<i64: 32, 32>}, {pipeline_mode = #tpu.pipeline_mode<synchronous>, transform_indices = @transform_3, window_bounds = array<i64: 32, 64>}, {pipeline_mode = #tpu.pipeline_mode<synchronous>, transform_indices = @transform_4, window_bounds = array<i64: 64, 128>}, {pipeline_mode = #tpu.pipeline_mode<synchronous>, transform_indices = @transform_5, window_bounds = array<i64: 4, 128>}, {transform_indices = @transform_6, window_bounds = array<i64: 2, 128>}]} {
    %c0 = arith.constant 0 : index
    %c0_0 = arith.constant 0 : index
    %0 = vector.load %arg1[%c0, %c0_0] : memref<2x16xf32, #tpu.memory_space<vmem>>, vector<2x16xf32>
    %c0_1 = arith.constant 0 : index
    %c0_2 = arith.constant 0 : index
    %1 = vector.load %arg6[%c0_1, %c0_2] : memref<4x128xf32, #tpu.memory_space<vmem>>, vector<4x128xf32>
    %2 = vector.extract_strided_slice %1 {offsets = [0, 0], sizes = [1, 32], strides = [1, 1]} : vector<4x128xf32> to vector<1x32xf32>
    %3 = vector.extract_strided_slice %1 {offsets = [1, 0], sizes = [1, 32], strides = [1, 1]} : vector<4x128xf32> to vector<1x32xf32>
    %4 = vector.extract_strided_slice %1 {offsets = [2, 0], sizes = [1, 64], strides = [1, 1]} : vector<4x128xf32> to vector<1x64xf32>
    %5 = vector.extract_strided_slice %1 {offsets = [3, 0], sizes = [1, 128], strides = [1, 1]} : vector<4x128xf32> to vector<1x128xf32>
    %c0_3 = arith.constant 0 : index
    %c0_4 = arith.constant 0 : index
    %6 = vector.load %arg2[%c0_3, %c0_4] : memref<16x32xf32, #tpu.memory_space<vmem>>, vector<16x32xf32>
    %cst = arith.constant dense<0.000000e+00> : vector<2x32xf32>
    %7 = tpu.matmul %0, %6, %cst {dimension_numbers = #tpu.dot_dimension_numbers<[1], [0], [0], [1], [0, 0, 1, 1], [], []>} : vector<2x16xf32>, vector<16x32xf32>, vector<2x32xf32> -> vector<2x32xf32>
    %8 = vector.broadcast %2 : vector<1x32xf32> to vector<2x32xf32>
    %9 = arith.addf %7, %8 : vector<2x32xf32>
    %cst_5 = arith.constant 0.000000e+00 : f32
    %10 = vector.broadcast %cst_5 : f32 to vector<2x32xf32>
    %11 = arith.maximumf %9, %10 : vector<2x32xf32>
    %c0_6 = arith.constant 0 : index
    %c0_7 = arith.constant 0 : index
    %12 = vector.load %arg3[%c0_6, %c0_7] : memref<32x32xf32, #tpu.memory_space<vmem>>, vector<32x32xf32>
    %cst_8 = arith.constant dense<0.000000e+00> : vector<2x32xf32>
    %13 = tpu.matmul %11, %12, %cst_8 {dimension_numbers = #tpu.dot_dimension_numbers<[1], [0], [0], [1], [0, 0, 1, 1], [], []>} : vector<2x32xf32>, vector<32x32xf32>, vector<2x32xf32> -> vector<2x32xf32>
    %14 = vector.broadcast %3 : vector<1x32xf32> to vector<2x32xf32>
    %15 = arith.addf %13, %14 : vector<2x32xf32>
    %cst_9 = arith.constant 0.000000e+00 : f32
    %16 = vector.broadcast %cst_9 : f32 to vector<2x32xf32>
    %17 = arith.maximumf %15, %16 : vector<2x32xf32>
    %c0_10 = arith.constant 0 : index
    %c0_11 = arith.constant 0 : index
    %18 = vector.load %arg4[%c0_10, %c0_11] : memref<32x64xf32, #tpu.memory_space<vmem>>, vector<32x64xf32>
    %cst_12 = arith.constant dense<0.000000e+00> : vector<2x64xf32>
    %19 = tpu.matmul %17, %18, %cst_12 {dimension_numbers = #tpu.dot_dimension_numbers<[1], [0], [0], [1], [0, 0, 1, 1], [], []>} : vector<2x32xf32>, vector<32x64xf32>, vector<2x64xf32> -> vector<2x64xf32>
    %20 = vector.broadcast %4 : vector<1x64xf32> to vector<2x64xf32>
    %21 = arith.addf %19, %20 : vector<2x64xf32>
    %cst_13 = arith.constant 0.000000e+00 : f32
    %22 = vector.broadcast %cst_13 : f32 to vector<2x64xf32>
    %23 = arith.maximumf %21, %22 : vector<2x64xf32>
    %c0_14 = arith.constant 0 : index
    %c0_15 = arith.constant 0 : index
    %24 = vector.load %arg5[%c0_14, %c0_15] : memref<64x128xf32, #tpu.memory_space<vmem>>, vector<64x128xf32>
    %cst_16 = arith.constant dense<0.000000e+00> : vector<2x128xf32>
    %25 = tpu.matmul %23, %24, %cst_16 {dimension_numbers = #tpu.dot_dimension_numbers<[1], [0], [0], [1], [0, 0, 1, 1], [], []>} : vector<2x64xf32>, vector<64x128xf32>, vector<2x128xf32> -> vector<2x128xf32>
    %26 = vector.broadcast %5 : vector<1x128xf32> to vector<2x128xf32>
    %27 = arith.addf %25, %26 : vector<2x128xf32>
    %c0_17 = arith.constant 0 : index
    %c0_18 = arith.constant 0 : index
    %28 = vector.load %arg7[%c0_17, %c0_18] : memref<2x128xf32, #tpu.memory_space<vmem>>, vector<2x128xf32>
    tpu.vector_store %arg7[%c0_17, %c0_18], %27 {strides = array<i32>} : memref<2x128xf32, #tpu.memory_space<vmem>>, vector<2x128xf32>,
    return
  }
  func.func @transform_0(%arg0: i32) -> (i32, i32) {
    %c0_i32 = arith.constant 0 : i32
    %c0_i32_0 = arith.constant 0 : i32
    return %arg0, %c0_i32 : i32, i32
  }
  func.func @transform_1(%arg0: i32) -> (i32, i32) {
    %c0_i32 = arith.constant 0 : i32
    %c0_i32_0 = arith.constant 0 : i32
    %c0_i32_1 = arith.constant 0 : i32
    return %c0_i32, %c0_i32_0 : i32, i32
  }
  func.func @transform_2(%arg0: i32) -> (i32, i32) {
    %c0_i32 = arith.constant 0 : i32
    %c0_i32_0 = arith.constant 0 : i32
    %c0_i32_1 = arith.constant 0 : i32
    return %c0_i32, %c0_i32_0 : i32, i32
  }
  func.func @transform_3(%arg0: i32) -> (i32, i32) {
    %c0_i32 = arith.constant 0 : i32
    %c0_i32_0 = arith.constant 0 : i32
    %c0_i32_1 = arith.constant 0 : i32
    return %c0_i32, %c0_i32_0 : i32, i32
  }
  func.func @transform_4(%arg0: i32) -> (i32, i32) {
    %c0_i32 = arith.constant 0 : i32
    %c0_i32_0 = arith.constant 0 : i32
    %c0_i32_1 = arith.constant 0 : i32
    return %c0_i32, %c0_i32_0 : i32, i32
  }
  func.func @transform_5(%arg0: i32) -> (i32, i32) {
    %c0_i32 = arith.constant 0 : i32
    %c0_i32_0 = arith.constant 0 : i32
    %c0_i32_1 = arith.constant 0 : i32
    return %c0_i32, %c0_i32_0 : i32, i32
  }
  func.func @transform_6(%arg0: i32) -> (i32, i32) {
    %c0_i32 = arith.constant 0 : i32
    %c0_i32_0 = arith.constant 0 : i32
    return %arg0, %c0_i32 : i32, i32
  }
}

</mosaic_0001>

<bundles_post_ra>
// kernel: tpu_custom_call.1
= control target key start
LH: loop header
LB: loop body
LE: loop exit
PB: predicated region body
PF: predicated region fallthrough
CT: control target
= control target key end

     0   :  { %11 = vsyncpa [#allocation3], 0  ;;  %s833_s0 = inlined_call_operand.hbm [shape: f32[2,16], index: 0, kind: input, shape index: {}]   ;;  %s834_s1 = inlined_call_operand.hbm [shape: f32[16,32], index: 1, kind: input, shape index: {}]   ;;  %s835_s2 = inlined_call_operand.hbm [shape: f32[32,32], index: 2, kind: input, shape index: {}]   ;;  %s836_s3 = inlined_call_operand.hbm [shape: f32[32,64], index: 3, kind: input, shape index: {}]   ;;  %s837_s4 = inlined_call_operand.hbm [shape: f32[64,128], index: 4, kind: input, shape index: {}]   ;;  %s838_s5 = inlined_call_operand.vmem [shape: f32[4,128], index: 5, kind: input, shape index: {}]   ;;  %s839_s6 = inlined_call_operand.hbm [shape: f32[2,128], index: 6, kind: output, shape index: {}]  }
   0x1   :  { %12 = vsyncpa [#allocation6], 0 }
   0x2   :  { %13 = vsyncpa [#allocation9], 0 }
   0x3   :  { %14 = vsyncpa [#allocation4], 0  ;;  %s694_s21 = smov [#allocation5]   ;;  %s554_s25 = scalar_lea.hbm %s834_s1, 256 }
   0x4   :  { %s30_s22 = sshll.u32 %s694_s21, 4  ;;  %p555_p0 = scmp.ne.s32.totalorder %s834_s1, %s554_s25  ;;  %s31_s22 = int_to_ptr.vmem [resolvable:$true] %s30_s22 }
   0x5   :  { %p558_p1 = scmp.lt.u32.totalorder %s554_s25, %s834_s1 }
   0x7   :  { %p560_p2 = pnand %p558_p1, %p555_p0 }
   0x9   :  { %563 = shalt.err (!%p560_p2)
}
   0xa   :  { %s564_s30 = scalar_lea.vmem %s31_s22, 256  ;;  %p569_p4 = scmp.lt.s32.totalorder %s31_s22, %s31_s22 }
   0xb   :  { %p565_p3 = scmp.ne.s32.totalorder %s31_s22, %s564_s30  ;;  %p570_p5 = scmp.lt.s32.totalorder %s564_s30, %s564_s30 }
   0xd   :  { %p571_p6 = por %p570_p5, %p569_p4 }
   0xf   :  { %p572_p7 = pnand %p571_p6, %p565_p3 }
  0x11   :  { %575 = shalt.err (!%p572_p7)
}
  0x12   :  { %s695_s7 = smov 128   ;;  %s696_s8 = smov 8  }
  0x13   :  { %36 = dma.hbm_to_vmem [thread:$0]  %s834_s1, 256, %s31_s22, [#allocation6], %s695_s7, %s695_s7, %s696_s8  }
  0x14   :  { %s697_s11 = smov [#allocation8]   ;;  %s698_s13 = smov [#allocation2]  }
  0x15   :  { %s54_s12 = sshll.u32 %s697_s11, 4  ;;  %s21_s14 = sshll.u32 %s698_s13, 4  ;;  %s55_s12 = int_to_ptr.vmem [resolvable:$true] %s54_s12  ;;  %s22_s14 = int_to_ptr.vmem [resolvable:$true] %s21_s14 }
  0x16   :  { %s576_s17 = scalar_lea.hbm %s836_s3, 512 }
  0x17   :  { %p577_p8 = scmp.ne.s32.totalorder %s836_s3, %s576_s17  ;;  %p580_p9 = scmp.lt.u32.totalorder %s576_s17, %s836_s3 }
  0x19   :  { %p582_p10 = pnand %p580_p9, %p577_p8 }
  0x1b   :  { %585 = shalt.err (!%p582_p10)
}
  0x1c   :  { %s586_s1 = scalar_lea.vmem %s55_s12, 512  ;;  %p591_p12 = scmp.lt.s32.totalorder %s55_s12, %s55_s12 }
  0x1d   :  { %p587_p11 = scmp.ne.s32.totalorder %s55_s12, %s586_s1  ;;  %p592_p13 = scmp.lt.s32.totalorder %s586_s1, %s586_s1 }
  0x1f   :  { %p593_p0 = por %p592_p13, %p591_p12 }
  0x21   :  { %p594_p1 = pnand %p593_p0, %p587_p11 }
  0x23   :  { %597 = shalt.err (!%p594_p1)
}
  0x24   :  { %60 = dma.hbm_to_vmem [thread:$0]  %s836_s3, 512, %s55_s12, [#allocation9], %s695_s7, %s695_s7, %s696_s8  }
  0x25   :  { %s598_s26 = scalar_lea.hbm %s833_s0, 32 }
  0x26   :  { %p599_p2 = scmp.ne.s32.totalorder %s833_s0, %s598_s26  ;;  %p602_p3 = scmp.lt.u32.totalorder %s598_s26, %s833_s0 }
  0x28   :  { %p604_p4 = pnand %p602_p3, %p599_p2 }
  0x2a   :  { %607 = shalt.err (!%p604_p4)
}
  0x2b   :  { %s608_s9 = scalar_lea.vmem %s22_s14, 32  ;;  %p613_p6 = scmp.lt.s32.totalorder %s22_s14, %s22_s14 }
  0x2c   :  { %p609_p5 = scmp.ne.s32.totalorder %s22_s14, %s608_s9  ;;  %p614_p7 = scmp.lt.s32.totalorder %s608_s9, %s608_s9 }
  0x2e   :  { %p615_p8 = por %p614_p7, %p613_p6 }
  0x30   :  { %p616_p9 = pnand %p615_p8, %p609_p5 }
  0x32   :  { %619 = shalt.err (!%p616_p9)
}
  0x33   :  { %24 = dma.hbm_to_vmem [thread:$0]  %s833_s0, 32, %s22_s14, [#allocation3]  }
  0x34   :  { %s699_s11 = smov [#allocation7]   ;;  %s700_s13 = smov [#allocation10]  }
  0x35   :  { %s42_s12 = sshll.u32 %s699_s11, 4  ;;  %s66_s15 = sshll.u32 %s700_s13, 4  ;;  %s43_s12 = int_to_ptr.vmem [resolvable:$true] %s42_s12  ;;  %s67_s15 = int_to_ptr.vmem [resolvable:$true] %s66_s15 }
  0x36   :  { %s620_s18 = scalar_lea.hbm %s835_s2, 512 }
  0x37   :  { %p621_p10 = scmp.ne.s32.totalorder %s835_s2, %s620_s18  ;;  %p624_p11 = scmp.lt.u32.totalorder %s620_s18, %s835_s2 }
  0x39   :  { %p626_p12 = pnand %p624_p11, %p621_p10 }
  0x3b   :  { %629 = shalt.err (!%p626_p12)
}
  0x3c   :  { %s630_s0 = scalar_lea.vmem %s43_s12, 512  ;;  %p635_p0 = scmp.lt.s32.totalorder %s43_s12, %s43_s12 }
  0x3d   :  { %p631_p13 = scmp.ne.s32.totalorder %s43_s12, %s630_s0  ;;  %p636_p1 = scmp.lt.s32.totalorder %s630_s0, %s630_s0 }
  0x3f   :  { %p637_p2 = por %p636_p1, %p635_p0 }
  0x41   :  { %p638_p3 = pnand %p637_p2, %p631_p13 }
  0x43   :  { %641 = shalt.err (!%p638_p3)
}
  0x44   :  { %48 = dma.hbm_to_vmem [thread:$0]  %s835_s2, 512, %s43_s12, [#allocation6], %s695_s7, %s695_s7, %s696_s8  }
  0x45   :  { %s642_s25 = scalar_lea.hbm %s837_s4, 1024 }
  0x46   :  { %p643_p4 = scmp.ne.s32.totalorder %s837_s4, %s642_s25  ;;  %p646_p5 = scmp.lt.u32.totalorder %s642_s25, %s837_s4 }
  0x48   :  { %p648_p6 = pnand %p646_p5, %p643_p4 }
  0x4a   :  { %651 = shalt.err (!%p648_p6)
}
  0x4b   :  { %s652_s30 = scalar_lea.vmem %s67_s15, 1024  ;;  %p657_p8 = scmp.lt.s32.totalorder %s67_s15, %s67_s15 }
  0x4c   :  { %p653_p7 = scmp.ne.s32.totalorder %s67_s15, %s652_s30  ;;  %p658_p9 = scmp.lt.s32.totalorder %s652_s30, %s652_s30 }
  0x4e   :  { %p659_p10 = por %p658_p9, %p657_p8 }
  0x50   :  { %p660_p11 = pnand %p659_p10, %p653_p7 }
  0x52   :  { %663 = shalt.err (!%p660_p11)
}
  0x53   :  { %72 = dma.hbm_to_vmem [thread:$0]  %s837_s4, 1024, %s67_s15, [#allocation9], %s695_s7, %s695_s7, %s696_s8  }
  0x54   :  { %686 = dma.done.wait [#allocation3], 32  }
  0x55   :  { %687 = vsyncadd [#allocation3], 4294967264 }
  0x56   :  { %688 = dma.done.wait [#allocation6], 768  }
  0x57   :  { %689 = vsyncadd [#allocation6], 4294966528 }
  0x58   :  { %690 = dma.done.wait [#allocation9], 1536  }
  0x59   :  { %691 = vsyncadd [#allocation9], 4294965760  ;;  %v701_v0 = vmov 0.0|0.0   ;;  %vm702_vm0 = vmmov 0   ;;  %v703_v1 = vmov 0.0   ;;  %v92_v2 = vld [vmem:[#allocation5] sm:$0xff]  ;;  %v94_v12 = vlaneseq }
  0x5a   :  { %516 = vmatprep.subr.bf16.mxu0 %v701_v0  ;;  %472 = vmatprep.mubr.msk.f32.mxu0 %vm702_vm0, %v703_v1  ;;  %v93_v3 = vld [vmem:[#allocation5 + $0x8] sm:$0xff]  ;;  %v173_v5 = vld [vmem:[#allocation7] sm:$0xff]  ;;  %v174_v6 = vld [vmem:[#allocation7 + $0x8] sm:$0xff]  ;;  %vm98_vm1 = vcmask 130048   ;;  %vm181_vm2 = vcmask 261120   ;;  %vm350_vm3 = vcmask 523264  }
  0x5b   :  { %531 = vmatprep.subr.bf16.mxu1 %v701_v0  ;;  %513 = vmatprep.mubr.msk.f32.mxu1 %vm702_vm0, %v703_v1  ;;  %v517_v4 = vpack.c.bf16 %v93_v3, %v92_v2  ;;  %v90_v7 = vld [vmem:[#allocation2] sm:$0x3]  ;;  %v520_v8 = vpack.c.bf16 %v174_v6, %v173_v5  ;;  %v175_v9 = vld [vmem:[#allocation7 + $0x10] sm:$0xff]  ;;  %v176_v10 = vld [vmem:[#allocation7 + $0x18] sm:$0xff]  ;;  %v95_v13 = vshrl.u32 %v94_v12, 7 }
  0x5c   :  { %v523_v11 = vpack.c.bf16 %v176_v10, %v175_v9  ;;  %v91_v15 = vld [vmem:[%s838_s5] sm:$0xf]  ;;  %v258_v24 = vld [vmem:[#allocation8 + $0x10] sm:$0xff]  ;;  %v259_v25 = vld [vmem:[#allocation8 + $0x18] sm:$0xff]  ;;  %s704_s5 = smov [#allocation11]  }
  0x5d   :  { %518 = vmatpush3.bf16.msra.mxu0 %v517_v4  ;;  %v96_v14 = vsub.s32 0, %v95_v13  ;;  %v256_v17 = vld [vmem:[#allocation8] sm:$0xff]  ;;  %v257_v18 = vld [vmem:[#allocation8 + $0x8] sm:$0xff]  ;;  %v529_v26 = vpack.c.bf16 %v259_v25, %v258_v24  ;;  %v340_v29 = vld [vmem:[#allocation10 + $0x10] sm:$0xff]  ;;  %v179_v36 = vsub.s32 1, %v95_v13  ;;  %v262_v45 = vsub.s32 2, %v95_v13 }
  0x5e   :  { %519 = vmatprep.subr.bf16.mxu0 %v701_v0  ;;  %v526_v22 = vpack.c.bf16 %v257_v18, %v256_v17  ;;  %v338_v27 = vld [vmem:[#allocation10] sm:$0xff]  ;;  %v339_v28 = vld [vmem:[#allocation10 + $0x8] sm:$0xff]  ;;  %v341_v31 = vld [vmem:[#allocation10 + $0x18] sm:$0xff]  ;;  %v348_v51 = vsub.s32 3, %v95_v13  ;;  %s431_s8 = sshll.u32 %s704_s5, 4  ;;  %s432_s8 = int_to_ptr.vmem [resolvable:$true] %s431_s8 }
  0x5f   :  { %v97_v16 = vrot.slane %v91_v15, %v96_v14  ;;  %v532_v30 = vpack.c.bf16 %v339_v28, %v338_v27  ;;  %v535_v32 = vpack.c.bf16 %v341_v31, %v340_v29  ;;  %v342_v33 = vld [vmem:[#allocation10 + $0x20] sm:$0xff]  ;;  %v343_v34 = vld [vmem:[#allocation10 + $0x28] sm:$0xff]  ;;  %v180_v37 = vrot.slane %v91_v15, %v179_v36  ;;  %v344_v42 = vld [vmem:[#allocation10 + $0x30] sm:$0xff]  ;;  %s664_s3 = scalar_lea.vmem %s432_s8, 32  ;;  %p669_p13 = scmp.lt.s32.totalorder %s432_s8, %s432_s8 }
  0x60   :  { %473 = vmatmul.mubr.msk.f32.vlgmr.msra.gmra.mrb[0].mxu0 %vm98_vm1, %v90_v7  ;;  %v538_v35 = vpack.c.bf16 %v343_v34, %v342_v33  ;;  %v345_v43 = vld [vmem:[#allocation10 + $0x38] sm:$0xff]  ;;  %v263_v46 = vrot.slane %v91_v15, %v262_v45  ;;  %v349_v52 = vrot.slane %v91_v15, %v348_v51  ;;  %p665_p12 = scmp.ne.s32.totalorder %s432_s8, %s664_s3  ;;  %p670_p0 = scmp.lt.s32.totalorder %s664_s3, %s664_s3 }
  0x61   :  { %521 = vmatpush3.bf16.msra.mxu0 %v520_v8  ;;  %483 = vmatprep.mubr.msk.f32.mxu0 %vm702_vm0, %v703_v1  ;;  %v541_v44 = vpack.c.bf16 %v345_v43, %v344_v42 }
  0x62   :  { %522 = vmatprep.subr.bf16.mxu0 %v701_v0  ;;  %533 = vmatpush3.bf16.msra.mxu1 %v532_v30  ;;  %p671_p1 = por %p670_p0, %p669_p13 }
  0x63   :  { %534 = vmatprep.subr.bf16.mxu1 %v701_v0 }
  0x64   :  { %p672_p2 = pnand %p671_p1, %p665_p12 }
  0x65   :  { %524 = vmatpush3.bf16.msra.mxu0 %v523_v11 }
  0x66   :  { %525 = vmatprep.subr.bf16.mxu0 %v701_v0  ;;  %536 = vmatpush3.bf16.msra.mxu1 %v535_v32 }
  0x67   :  { %537 = vmatprep.subr.bf16.mxu1 %v701_v0 }
  0x6a   :  { %539 = vmatpush3.bf16.msra.mxu1 %v538_v35 }
  0x6b   :  { %540 = vmatprep.subr.bf16.mxu1 %v701_v0 }
  0x6e   :  { %542 = vmatpush3.bf16.msra.mxu1 %v541_v44 }
 0x133   :  { %v168_v19 = vpop.f32.mrb[0].mxu0 }
 0x134   :  { %v169_v20 = vadd.f32 %v168_v19, %v97_v16  ;;  %v474_v21 = vpop.f32.mrb[1].mxu0 }
 0x136   :  { %v172_v23 = vmax.f32 %v169_v20, 0.0 }
 0x138   :  { %484 = vmatmul.mubr.msk.f32.vlgmr.msra.gmra.mrb[2].mxu0 %vm181_vm2, %v172_v23 }
 0x139   :  { %527 = vmatpush3.bf16.msra.mxu0 %v526_v22  ;;  %494 = vmatprep.mubr.msk.f32.mxu0 %vm702_vm0, %v703_v1 }
 0x13a   :  { %528 = vmatprep.subr.bf16.mxu0 %v701_v0 }
 0x13d   :  { %530 = vmatpush3.bf16.msra.mxu0 %v529_v26 }
 0x20b   :  { %v251_v38 = vpop.f32.mrb[2].mxu0 }
 0x20c   :  { %v252_v39 = vadd.f32 %v251_v38, %v180_v37  ;;  %v485_v40 = vpop.f32.mrb[3].mxu0 }
 0x20e   :  { %v255_v41 = vmax.f32 %v252_v39, 0.0 }
 0x210   :  { %495 = vmatmul.mubr.msk.f32.vlgmr.msra.gmra.mrb[4].mxu0 %vm181_vm2, %v255_v41 }
 0x2e3   :  { %v333_v47 = vpop.f32.mrb[4].mxu0 }
 0x2e4   :  { %v334_v48 = vadd.f32 %v333_v47, %v263_v46  ;;  %v496_v49 = vpop.f32.mrb[5].mxu0 }
 0x2e6   :  { %v337_v50 = vmax.f32 %v334_v48, 0.0 }
 0x2e8   :  { %514 = vmatmul.mubr.msk.f32.vlgmr.msra.gmra.mrb[0].mxu1 %vm350_vm3, %v337_v50 }
 0x3bb   :  { %v420_v53 = vpop.f32.mrb[0].mxu1 }
 0x3bc   :  { %v421_v54 = vadd.f32 %v420_v53, %v349_v52  ;;  %v515_v55 = vpop.f32.mrb[1].mxu1 }
 0x3be   :  { %424 = vst [vmem:[#allocation11] sm:$0x3] %v421_v54 }
 0x3bf   :  { %675 = shalt.err (!%p672_p2)
}
 0x3c0   :  { %s676_s12 = scalar_lea.hbm %s839_s6, 32 }
 0x3c1   :  { %p677_p3 = scmp.ne.s32.totalorder %s839_s6, %s676_s12  ;;  %p680_p4 = scmp.lt.u32.totalorder %s676_s12, %s839_s6 }
 0x3c3   :  { %p682_p5 = pnand %p680_p4, %p677_p3 }
 0x3c5   :  { %685 = shalt.err (!%p682_p5)
}
 0x3c6   :  { %434 = dma.vmem_to_hbm [thread:$0]  %s432_s8, 32, %s839_s6, [#allocation4]  }
 0x3c7   :  { %692 = dma.done.wait [#allocation4], 32  }
 0x3c8   :  { %693 = vsyncadd [#allocation4], 4294967264 }
 0x3c9   :  { %438 = vsyncpa [#allocation3], 1 }
 0x3ca   :  { %439 = vsyncpa [#allocation6], 1 }
 0x3cb   :  { %440 = vsyncpa [#allocation9], 1 }
 0x3cc   :  { %441 = vsyncpa [#allocation4], 1 }

</bundles_post_ra>
